<compile_context>
chip_gen: v7x
topology: tpu7x:2x2x1
jax: 0.10.0
libtpu: 0.0.40
codegen_flags: <defaults>
</compile_context>

<pallas_src>
import jax
import jax.numpy as jnp
from jax.experimental import pallas as pl
from jax.experimental.pallas import tpu as pltpu

_LANES = 128
_SUBLANES = 8
_NUM_CORE_SPLITS = 2          # per-core partial sums (v7x has 2 TCs per chip)
_MAX_ROWS_PER_TILE = 2048     # 2048 * 128 * 4 B = 1 MiB input tile per buffer


def _round_up(n, m):
    return ((n + m - 1) // m) * m


def _make_kernel(rows_per_tile):
    def kernel(x_ref, o_ref):
        # o_ref: (8, 128) f32 per-core accumulator, resident across the inner
        # ("arbitrary") reduction axis.
        @pl.when(pl.program_id(1) == 0)
        def _():
            o_ref[...] = jnp.zeros_like(o_ref)

        tile = x_ref[...]                       # (rows_per_tile, 128)
        if tile.dtype != jnp.float32:           # only emitted for non-f32 inputs
            tile = tile.astype(jnp.float32)
        diff = jnp.abs(1.0 - tile)              # VPU elementwise
        # Partial reduce with VPU vreg adds only (no cross-lane XLU work):
        # the (r//8, 8, 128) reshape keeps every (8, 128) vreg intact.
        o_ref[...] += diff.reshape(
            rows_per_tile // _SUBLANES, _SUBLANES, _LANES
        ).sum(axis=0)

    return kernel


def _same_contrastive_loss(x):
    """x: (B, C, H, W) -> scalar f32 = sum(|1 - x[:, 0]|)."""
    B, C, H, W = x.shape
    n = B * H * W

    # ---- wrapper-side layout: channel 0, lane-dense, padded with 1.0 ----
    rows = pl.cdiv(n, _LANES)
    rows_per_core = pl.cdiv(rows, _NUM_CORE_SPLITS)
    rows_per_tile = min(_MAX_ROWS_PER_TILE, _round_up(rows_per_core, _SUBLANES))
    blocks_per_core = pl.cdiv(rows_per_core, rows_per_tile)
    padded_rows = _NUM_CORE_SPLITS * blocks_per_core * rows_per_tile
    padded_n = padded_rows * _LANES

    x1 = x[:, 0].reshape(-1)                               # channel-0 data only
    x1 = jnp.pad(x1, (0, padded_n - n), constant_values=1)  # |1 - 1| = 0
    x2d = x1.reshape(padded_rows, _LANES)

    itemsize = jnp.dtype(x.dtype).itemsize
    out = pl.pallas_call(
        _make_kernel(rows_per_tile),
        out_shape=jax.ShapeDtypeStruct(
            (_NUM_CORE_SPLITS * _SUBLANES, _LANES), jnp.float32
        ),
        grid_spec=pltpu.PrefetchScalarGridSpec(
            num_scalar_prefetch=0,
            grid=(_NUM_CORE_SPLITS, blocks_per_core),
            in_specs=[
                pl.BlockSpec(
                    (rows_per_tile, _LANES),
                    lambda c, i: (c * blocks_per_core + i, 0),
                ),
            ],
            # Each core owns its own 8-row slice of the output -> no race when
            # the leading axis is split across TensorCores.
            out_specs=pl.BlockSpec((_SUBLANES, _LANES), lambda c, i: (c, 0)),
        ),
        compiler_params=pltpu.CompilerParams(
            dimension_semantics=("parallel", "arbitrary"),
        ),
        cost_estimate=pl.CostEstimate(
            flops=2 * n,
            transcendentals=0,
            bytes_accessed=padded_n * itemsize
            + _NUM_CORE_SPLITS * _SUBLANES * _LANES * 4,
        ),
    )(x2d)

    # Single cheap cross-lane reduce of the two (8, 128) per-core partials.
    return jnp.sum(out)


same_contrastive_loss = jax.jit(_same_contrastive_loss)


if __name__ == "__main__":
    key = jax.random.PRNGKey(0)
    x = jax.random.normal(key, (2, 4, 16, 16), dtype=jnp.float32)

    loss = jax.block_until_ready(same_contrastive_loss(x))

    # reference check in plain JAX
    ref = jnp.sum(jnp.abs(1.0 - x[:, 0]))
    assert jnp.allclose(loss, ref, rtol=1e-5, atol=1e-4), (loss, ref)

    print("KERNEL_OK")
</pallas_src>

<mosaic_0001>
module attributes {stable_mosaic.version = 11 : i64} {
  func.func @kernel(%arg0: i32, %arg1: i32, %arg2: memref<8x128xf32, #tpu.memory_space<vmem>>, %arg3: memref<8x128xf32, #tpu.memory_space<vmem>>) attributes {dimension_semantics = [#tpu.dimension_semantics<parallel>, #tpu.dimension_semantics<arbitrary>], iteration_bounds = array<i64: 2, 1>, scalar_prefetch = 0 : i64, scratch_operands = 0 : i64, tpu.core_type = #tpu.core_type<tc>, window_params = [{transform_indices = @transform_0, window_bounds = array<i64: 8, 128>}, {transform_indices = @transform_1, window_bounds = array<i64: 8, 128>}]} {
    %c0_i32 = arith.constant 0 : i32
    %0 = arith.cmpi eq, %arg1, %c0_i32 : i32
    %1 = arith.extui %0 : i1 to i32
    %c0_i32_0 = arith.constant 0 : i32
    %2 = arith.cmpi ne, %1, %c0_i32_0 : i32
    scf.if %2 {
      %cst_7 = arith.constant 0.000000e+00 : f32
      %12 = vector.broadcast %cst_7 : f32 to vector<8x128xf32>
      %c0_8 = arith.constant 0 : index
      %c0_9 = arith.constant 0 : index
      %13 = vector.load %arg3[%c0_8, %c0_9] : memref<8x128xf32, #tpu.memory_space<vmem>>, vector<8x128xf32>
      tpu.vector_store %arg3[%c0_8, %c0_9], %12 {strides = array<i32>} : memref<8x128xf32, #tpu.memory_space<vmem>>, vector<8x128xf32>,
    } else {
    }
    %c0 = arith.constant 0 : index
    %c0_1 = arith.constant 0 : index
    %3 = vector.load %arg2[%c0, %c0_1] : memref<8x128xf32, #tpu.memory_space<vmem>>, vector<8x128xf32>
    %cst = arith.constant 1.000000e+00 : f32
    %4 = vector.broadcast %cst : f32 to vector<8x128xf32>
    %5 = arith.subf %4, %3 : vector<8x128xf32>
    %6 = math.absf %5 : vector<8x128xf32>
    %c0_2 = arith.constant 0 : index
    %c0_3 = arith.constant 0 : index
    %7 = vector.load %arg3[%c0_2, %c0_3] : memref<8x128xf32, #tpu.memory_space<vmem>>, vector<8x128xf32>
    %8 = vector.shape_cast %6 : vector<8x128xf32> to vector<1x8x128xf32>
    %cst_4 = arith.constant dense<0.000000e+00> : vector<8x128xf32>
    %9 = vector.multi_reduction <add>, %8, %cst_4 [0] : vector<1x8x128xf32> to vector<8x128xf32>
    %10 = arith.addf %7, %9 : vector<8x128xf32>
    %c0_5 = arith.constant 0 : index
    %c0_6 = arith.constant 0 : index
    %11 = vector.load %arg3[%c0_5, %c0_6] : memref<8x128xf32, #tpu.memory_space<vmem>>, vector<8x128xf32>
    tpu.vector_store %arg3[%c0_5, %c0_6], %10 {strides = array<i32>} : memref<8x128xf32, #tpu.memory_space<vmem>>, vector<8x128xf32>,
    return
  }
  func.func @transform_0(%arg0: i32, %arg1: i32) -> (i32, i32) {
    %c1_i32 = arith.constant 1 : i32
    %0 = arith.muli %arg0, %c1_i32 : i32
    %1 = arith.addi %0, %arg1 : i32
    %c0_i32 = arith.constant 0 : i32
    %c0_i32_0 = arith.constant 0 : i32
    return %1, %c0_i32 : i32, i32
  }
  func.func @transform_1(%arg0: i32, %arg1: i32) -> (i32, i32) {
    %c0_i32 = arith.constant 0 : i32
    %c0_i32_0 = arith.constant 0 : i32
    return %arg0, %c0_i32 : i32, i32
  }
}

</mosaic_0001>

<bundles_post_ra>
// kernel: squeeze.1
= control target key start
LH: loop header
LB: loop body
LE: loop exit
PB: predicated region body
PF: predicated region fallthrough
CT: control target
= control target key end

     0   :  { %s67_s8 = smov 112   ;;  %s68_s11 = smov 80   ;;  %vm3_vm0 = vcmask 130048   ;;  %vm9_vm1 = vcmask 1048448   ;;  %vm15_vm2 = vcmask 917248   ;;  %vm21_vm3 = vcmask 786048   ;;  %s111_s0 = inlined_call_operand.vmem [shape: f32[2,1,16,16], index: 0, kind: input, shape index: {}]   ;;  %s112_s1 = inlined_call_operand.vmem [shape: f32[512], index: 1, kind: output, shape index: {}]  }
   0x1   :  { %v53_v0 = vld [vmem:[%s111_s0 + $0x7] ss:$8 sm:$0xf]   ;;  %v55_v1 = vld [vmem:[%s111_s0 + $0x5] ss:$8 sm:$0xf]  }
   0x2   :  { %7 = vrot.lane.b32.xlu0 %v53_v0, %s67_s8  ;;  %19 = vrot.lane.b32.xlu1 %v55_v1, %s68_s11  ;;  %v54_v2 = vld [vmem:[%s111_s0 + $0x6] ss:$8 sm:$0xf]   ;;  %v56_v3 = vld [vmem:[%s111_s0 + $0x4] ss:$8 sm:$0xf]  }
   0x3   :  { %s69_s16 = smov 96   ;;  %v2_v4 = vld [vmem:[%s111_s0] ss:$8 sm:$0xf]   ;;  %s70_s19 = smov 64   ;;  %vm27_vm4 = vcmask 654848  }
   0x4   :  { %v57_v5 = vld [vmem:[%s111_s0 + $0x3] ss:$8 sm:$0xf]   ;;  %4 = vst.msk [vmem:[#allocation0] sm:$0xf] %vm3_vm0, %v2_v4   ;;  %s71_s24 = smov 48  }
   0x5   :  { %v58_v6 = vld [vmem:[%s111_s0 + $0x2] ss:$8 sm:$0xf]   ;;  %s72_s25 = smov 32   ;;  %vm33_vm5 = vcmask 523648   ;;  %vm39_vm6 = vcmask 392448  }
   0x6   :  { %13 = vrot.lane.b32.xlu0 %v54_v2, %s69_s16  ;;  %25 = vrot.lane.b32.xlu1 %v56_v3, %s70_s19  ;;  %v59_v7 = vld [vmem:[%s111_s0 + $0x1] ss:$8 sm:$0xf]   ;;  %s73_s0 = smov 16   ;;  %vm45_vm7 = vcmask 261248  }
   0xa   :  { %31 = vrot.lane.b32.xlu0 %v57_v5, %s71_s24  ;;  %37 = vrot.lane.b32.xlu1 %v58_v6, %s72_s25 }
   0xe   :  { %43 = vrot.lane.b32.xlu0 %v59_v7, %s73_s0 }
  0x74   :  { %v8_v8 = vpop.permute.xlu0 %7   ;;  %v20_v9 = vpop.permute.xlu1 %19  }
  0x75   :  { %10 = vst.msk [vmem:[#allocation0] sm:$0xf] %vm9_vm1, %v8_v8  }
  0x78   :  { %v14_v10 = vpop.permute.xlu0 %13   ;;  %v26_v11 = vpop.permute.xlu1 %25  }
  0x79   :  { %16 = vst.msk [vmem:[#allocation0] sm:$0xf] %vm15_vm2, %v14_v10  }
  0x7a   :  { %22 = vst.msk [vmem:[#allocation0] sm:$0xf] %vm21_vm3, %v20_v9  }
  0x7b   :  { %28 = vst.msk [vmem:[#allocation0] sm:$0xf] %vm27_vm4, %v26_v11  }
  0x7c   :  { %v32_v12 = vpop.permute.xlu0 %31   ;;  %v38_v13 = vpop.permute.xlu1 %37  }
  0x7d   :  { %34 = vst.msk [vmem:[#allocation0] sm:$0xf] %vm33_vm5, %v32_v12  }
  0x7e   :  { %40 = vst.msk [vmem:[#allocation0] sm:$0xf] %vm39_vm6, %v38_v13  }
  0x80   :  { %v44_v14 = vpop.permute.xlu0 %43  }
  0x81   :  { %46 = vst.msk [vmem:[#allocation0] sm:$0xf] %vm45_vm7, %v44_v14  }
  0x88   :  { %v50_v15 = vld [vmem:[#allocation0] sm:$0xf] }
  0x89   :  { %52 = vst [vmem:[%s112_s1] sm:$0xf] %v50_v15 }

// kernel: _same_contrastive_loss.1
= control target key start
LH: loop header
LB: loop body
LE: loop exit
PB: predicated region body
PF: predicated region fallthrough
CT: control target
= control target key end

     0   :  { %s272_s6 = smov 0   ;;  %s254_s7 = smov 0   ;;  %s283_s0 = inlined_call_operand.vmem [shape: f32[16,128], index: 0, kind: input, shape index: {}]   ;;  %s284_s1 = inlined_call_operand.vmem [shape: f32[16,128], index: 1, kind: output, shape index: {}]  }
   0x1   :  { %s258_s8 = smov 0  }
   0x2 LB: > { %s23_s9 = sadd.s32 1, %s256_s7  ;;  %p208_p0 = scmp.ge.s32.totalorder %s260_s8, 1  ;;  %s260_s8 = sphi %s258_s8, %s11_s8   ;;  %s256_s7 = sphi %s254_s7, %s255_s7   ;;  %s252_s6 = sphi %s272_s6, %s285_s6  }
   0x3   : > { %p25_p1 = scmp.ge.s32.totalorder %s23_s9, 2  ;;  %p102_p2 = scmp.lt.s32.totalorder %s260_s8, 3 }
   0x5   : > { %s287_s9 = smov (%p25_p1, %s23_s9), 0  ;;  %p103_p3 = pnand %p208_p0, %p102_p2 }
   0x6   : > { %p122_p4 = scmp.lt.s32.totalorder (!%p103_p3), %s252_s6, 1 }
   0x7   : > { %106 = sbr.rel (%p103_p3) target bundleno = 23 (0x17), region = 24 }
   0xe   : > { %s289_s6 = smov (!%p122_p4, %s252_s6), 1 }
   0xf   : > { %s209_s10 = sshll.u32 %s289_s6, 3 }
  0x10   : > { %s125_s13 = scalar_lea.vmem %s283_s0, %s209_s10  ;;  %s130_s16 = scalar_lea.vmem %s284_s1, %s209_s10 }
  0x11   : > { %v136_v0 = vld [vmem:[%s125_s13] sm:$0xff] }
  0x12   : > { %v137_v1 = vsub.f32 1.0, %v136_v0 }
  0x14   : > { %v138_v2 = vand.u32 2147483647, %v137_v1 }
  0x16   : > { %142 = vst [vmem:[%s130_s16] sm:$0xff] %v138_v2 }
  0x17 PF: > { %s11_s8 = sadd.s32 1, %s260_s8   ;;  %s285_s6 = smov %s256_s7 }
  0x18   : > { %p8_p5 = scmp.ge.s32.totalorder %s11_s8, 4   ;;  %s255_s7 = smov %s287_s9  }
  0x1a   :  { %10 = sbr.rel (!%p8_p5) target bundleno = 2 (0x2), region = 58 }

</bundles_post_ra>
